<compile_context>
chip_gen: v5e
topology: v5e:2x2
jax: 0.10.0
libtpu: 0.0.40
codegen_flags: <defaults>
</compile_context>

<pallas_src>
import functools
import math

import jax
import jax.numpy as jnp
from jax.experimental import pallas as pl
from jax.experimental.pallas import tpu as pltpu


_VMEM_LIMIT_BYTES = 32 * 1024 * 1024          # safe on v5e / v6e / v7x
_REDUCE_LANES_CANDIDATES = (1024, 512, 256, 128)
_FILL_LANES_CANDIDATES = (2048, 1024, 512, 256, 128)
_MAX_REDUCE_ROW_TILE = 512                    # 512 x lanes f32 tile (<= 2 MiB)
_FILL_BLOCK_BYTES = 4 * 1024 * 1024           # ~4 MiB output blocks


# ---------------------------------------------------------------------------
# Phase 1: tiled global-sum reduction (lane-dense loads, VPU accumulation).
# ---------------------------------------------------------------------------
def _partial_sum_kernel(x_ref, acc_ref):
    """Accumulate per-tile partial sums into an (8, lanes) f32 accumulator."""
    @pl.when(pl.program_id(0) == 0)
    def _():
        acc_ref[...] = jnp.zeros_like(acc_ref)

    rt, lw = x_ref.shape
    x = x_ref[...].astype(jnp.float32)
    # (rt, lw) -> (rt//8, 8, lw): pure element-wise VPU adds over the leading
    # axis; the single cross-lane reduce happens once, outside the kernel.
    acc_ref[...] += jnp.sum(x.reshape(rt // 8, 8, lw), axis=0)


def _global_mean_plus1(x: jax.Array) -> jax.Array:
    """Return (mean(x) + 1) as a (1, 1) float32 array."""
    total = x.size
    x_flat = x.reshape(-1)

    # Prefer a lane width that avoids any padding (rows ends up a multiple of 8).
    lanes = 512
    for cand in _REDUCE_LANES_CANDIDATES:
        if total % (cand * 8) == 0:
            lanes = cand
            break

    rows = -(-total // lanes)
    if rows <= _MAX_REDUCE_ROW_TILE:
        rows_p = -(-rows // 8) * 8
        row_tile = rows_p
    else:
        rows_p = -(-rows // _MAX_REDUCE_ROW_TILE) * _MAX_REDUCE_ROW_TILE
        row_tile = _MAX_REDUCE_ROW_TILE

    padded = rows_p * lanes
    if padded != total:
        # Zero padding is sum-neutral; the divide below uses the true count.
        x_flat = jnp.pad(x_flat, (0, padded - total))
    x2d = x_flat.reshape(rows_p, lanes)
    grid = rows_p // row_tile

    partials = pl.pallas_call(
        _partial_sum_kernel,
        out_shape=jax.ShapeDtypeStruct((8, lanes), jnp.float32),
        grid_spec=pltpu.PrefetchScalarGridSpec(
            num_scalar_prefetch=0,
            grid=(grid,),
            in_specs=[pl.BlockSpec((row_tile, lanes), lambda i: (i, 0))],
            out_specs=pl.BlockSpec((8, lanes), lambda i: (0, 0)),
        ),
        compiler_params=pltpu.CompilerParams(
            dimension_semantics=("arbitrary",),   # accumulator lives across it
            vmem_limit_bytes=_VMEM_LIMIT_BYTES,
        ),
        cost_estimate=pl.CostEstimate(
            flops=padded,
            transcendentals=0,
            bytes_accessed=4 * padded + 4 * 8 * lanes,
        ),
    )(x2d)

    mean_plus1 = jnp.sum(partials) * (1.0 / float(total)) + 1.0
    return mean_plus1.reshape(1, 1).astype(jnp.float32)


# ---------------------------------------------------------------------------
# Phase 2: lane-dense constant fill of the output.
# ---------------------------------------------------------------------------
def _fill_kernel(val_ref, o_ref):
    # val_ref is a (1, 1) f32 scalar in SMEM; broadcast-fill the output block.
    o_ref[...] = jnp.full(o_ref.shape, val_ref[0, 0], dtype=o_ref.dtype)


def _broadcast_fill(value_11: jax.Array, out_shape, dtype) -> jax.Array:
    total = math.prod(out_shape)
    itemsize = jnp.dtype(dtype).itemsize

    lanes = None
    for cand in _FILL_LANES_CANDIDATES:
        if total % cand == 0:
            lanes = cand
            break
    if lanes is None:
        # Not lane-alignable without an extra copy; XLA's fill is already roofline.
        return jnp.full(out_shape, value_11[0, 0], dtype=dtype)

    rows = total // lanes
    max_rows = max(8, _FILL_BLOCK_BYTES // (itemsize * lanes))
    if rows <= max_rows:
        row_tile = rows
    else:
        row_tile = None
        for cand in (2048, 1024, 512, 256, 128, 64, 32, 16, 8):
            if cand <= max_rows and rows % cand == 0:
                row_tile = cand
                break
        if row_tile is None:
            return jnp.full(out_shape, value_11[0, 0], dtype=dtype)
    grid = rows // row_tile

    flat = pl.pallas_call(
        _fill_kernel,
        out_shape=jax.ShapeDtypeStruct((rows, lanes), dtype),
        grid_spec=pltpu.PrefetchScalarGridSpec(
            num_scalar_prefetch=0,
            grid=(grid,),
            in_specs=[pl.BlockSpec(memory_space=pltpu.MemorySpace.SMEM)],
            out_specs=pl.BlockSpec((row_tile, lanes), lambda i: (i, 0)),
        ),
        compiler_params=pltpu.CompilerParams(
            dimension_semantics=("parallel",),    # independent fill blocks
            vmem_limit_bytes=_VMEM_LIMIT_BYTES,
        ),
        cost_estimate=pl.CostEstimate(
            flops=0,
            transcendentals=0,
            bytes_accessed=total * itemsize + 4,
        ),
    )(value_11)
    return flat.reshape(out_shape)


# ---------------------------------------------------------------------------
# Public wrapper (Plus1Block.forward equivalent).
# ---------------------------------------------------------------------------
@functools.partial(jax.jit, static_argnums=1)
def plus1_block(x: jax.Array, out_channels: int) -> jax.Array:
    """x: (N, C_in, H, W) -> (N, out_channels, H, W), all values = x.mean() + 1."""
    n, _, h, w = x.shape
    out_shape = (n, out_channels, h, w)
    mean_plus1 = _global_mean_plus1(x)
    return _broadcast_fill(mean_plus1, out_shape, x.dtype)


if __name__ == "__main__":
    in_channels = 4
    out_channels = 6
    key = jax.random.PRNGKey(0)
    x = jax.random.normal(key, (2, in_channels, 16, 16), dtype=jnp.float32)

    out = plus1_block(x, out_channels)
    out = jax.block_until_ready(out)

    # Reference check against plain JAX semantics of the PyTorch module.
    ref = (jnp.mean(x) + 1.0) * jnp.ones((2, out_channels, 16, 16), dtype=x.dtype)
    assert out.shape == (2, out_channels, 16, 16), out.shape
    assert jnp.allclose(out, ref, atol=1e-5, rtol=1e-5), "mismatch vs reference"

    print("KERNEL_OK")
</pallas_src>

<mosaic_0001>
module attributes {stable_mosaic.version = 11 : i64} {
  func.func @_partial_sum_kernel(%arg0: i32, %arg1: memref<8x256xf32, #tpu.memory_space<vmem>>, %arg2: memref<8x256xf32, #tpu.memory_space<vmem>>) attributes {dimension_semantics = [#tpu.dimension_semantics<arbitrary>], iteration_bounds = array<i64: 1>, scalar_prefetch = 0 : i64, scratch_operands = 0 : i64, tpu.core_type = #tpu.core_type<tc>, window_params = [{transform_indices = @transform_0, window_bounds = array<i64: 8, 256>}, {pipeline_mode = #tpu.pipeline_mode<synchronous>, transform_indices = @transform_1, window_bounds = array<i64: 8, 256>}]} {
    %c0_i32 = arith.constant 0 : i32
    %0 = arith.cmpi eq, %arg0, %c0_i32 : i32
    %1 = arith.extui %0 : i1 to i32
    %c0_i32_0 = arith.constant 0 : i32
    %2 = arith.cmpi ne, %1, %c0_i32_0 : i32
    scf.if %2 {
      %cst_6 = arith.constant 0.000000e+00 : f32
      %9 = vector.broadcast %cst_6 : f32 to vector<8x256xf32>
      %c0_7 = arith.constant 0 : index
      %c0_8 = arith.constant 0 : index
      %10 = vector.load %arg2[%c0_7, %c0_8] : memref<8x256xf32, #tpu.memory_space<vmem>>, vector<8x256xf32>
      tpu.vector_store %arg2[%c0_7, %c0_8], %9 {strides = array<i32>} : memref<8x256xf32, #tpu.memory_space<vmem>>, vector<8x256xf32>,
    } else {
    }
    %c0 = arith.constant 0 : index
    %c0_1 = arith.constant 0 : index
    %3 = vector.load %arg1[%c0, %c0_1] : memref<8x256xf32, #tpu.memory_space<vmem>>, vector<8x256xf32>
    %c0_2 = arith.constant 0 : index
    %c0_3 = arith.constant 0 : index
    %4 = vector.load %arg2[%c0_2, %c0_3] : memref<8x256xf32, #tpu.memory_space<vmem>>, vector<8x256xf32>
    %5 = vector.shape_cast %3 : vector<8x256xf32> to vector<1x8x256xf32>
    %cst = arith.constant dense<0.000000e+00> : vector<8x256xf32>
    %6 = vector.multi_reduction <add>, %5, %cst [0] : vector<1x8x256xf32> to vector<8x256xf32>
    %7 = arith.addf %4, %6 : vector<8x256xf32>
    %c0_4 = arith.constant 0 : index
    %c0_5 = arith.constant 0 : index
    %8 = vector.load %arg2[%c0_4, %c0_5] : memref<8x256xf32, #tpu.memory_space<vmem>>, vector<8x256xf32>
    tpu.vector_store %arg2[%c0_4, %c0_5], %7 {strides = array<i32>} : memref<8x256xf32, #tpu.memory_space<vmem>>, vector<8x256xf32>,
    return
  }
  func.func @transform_0(%arg0: i32) -> (i32, i32) {
    %c0_i32 = arith.constant 0 : i32
    %c0_i32_0 = arith.constant 0 : i32
    return %arg0, %c0_i32 : i32, i32
  }
  func.func @transform_1(%arg0: i32) -> (i32, i32) {
    %c0_i32 = arith.constant 0 : i32
    %c0_i32_0 = arith.constant 0 : i32
    %c0_i32_1 = arith.constant 0 : i32
    return %c0_i32, %c0_i32_0 : i32, i32
  }
}

module attributes {stable_mosaic.version = 11 : i64} {
  func.func @_fill_kernel(%arg0: i32, %arg1: memref<1x1xf32, #tpu.memory_space<smem>>, %arg2: memref<3x1024xf32, #tpu.memory_space<vmem>>) attributes {dimension_semantics = [#tpu.dimension_semantics<parallel>], iteration_bounds = array<i64: 1>, scalar_prefetch = 0 : i64, scratch_operands = 0 : i64, tpu.core_type = #tpu.core_type<tc>, window_params = [{transform_indices = @transform_0, window_bounds = array<i64: 1, 1>}, {transform_indices = @transform_1, window_bounds = array<i64: 3, 1024>}]} {
    %c0 = arith.constant 0 : index
    %c0_0 = arith.constant 0 : index
    %0 = memref.load %arg1[%c0, %c0_0] : memref<1x1xf32, #tpu.memory_space<smem>>
    %1 = vector.broadcast %0 : f32 to vector<3x1024xf32>
    %c0_1 = arith.constant 0 : index
    %c0_2 = arith.constant 0 : index
    %2 = vector.load %arg2[%c0_1, %c0_2] : memref<3x1024xf32, #tpu.memory_space<vmem>>, vector<3x1024xf32>
    tpu.vector_store %arg2[%c0_1, %c0_2], %1 {strides = array<i32>} : memref<3x1024xf32, #tpu.memory_space<vmem>>, vector<3x1024xf32>,
    return
  }
  func.func @transform_0(%arg0: i32) -> (i32, i32) {
    %c0_i32 = arith.constant 0 : i32
    %c0_i32_0 = arith.constant 0 : i32
    %c0_i32_1 = arith.constant 0 : i32
    return %c0_i32, %c0_i32_0 : i32, i32
  }
  func.func @transform_1(%arg0: i32) -> (i32, i32) {
    %c0_i32 = arith.constant 0 : i32
    %c0_i32_0 = arith.constant 0 : i32
    return %arg0, %c0_i32 : i32, i32
  }
}

</mosaic_0001>

<bundles_post_ra>
// kernel: plus1_block.2
= control target key start
LH: loop header
LB: loop body
LE: loop exit
PB: predicated region body
PF: predicated region fallthrough
CT: control target
= control target key end

     0   :  { %s51_s0 = inlined_call_operand.vmem [shape: f32[8,256], index: 0, kind: input, shape index: {}]   ;;  %s52_s1 = inlined_call_operand.vmem [shape: f32[8,256], index: 1, kind: output, shape index: {}]  }
   0x1   :  { %v14_v0 = vld [vmem:[%s51_s0] sm:$0xff]  ;;  %v15_v1 = vld [vmem:[%s51_s0 + $0x8] sm:$0xff] }
   0x2   :  { %22 = vst [vmem:[%s52_s1] sm:$0xff] %v14_v0 }
   0x3   :  { %23 = vst [vmem:[%s52_s1 + $0x8] sm:$0xff] %v15_v1 }

// kernel: plus1_block.3
= control target key start
LH: loop header
LB: loop body
LE: loop exit
PB: predicated region body
PF: predicated region fallthrough
CT: control target
= control target key end

     0   :  { %s44_s0 = inlined_call_operand.<no memory space> [shape: f32[1,1], index: 0, kind: input, shape index: {}]   ;;  %s45_s1 = inlined_call_operand.vmem [shape: f32[3,1024], index: 1, kind: output, shape index: {}]  }
   0x1   :  { %v10_v0 = vstv %s44_s0 }
   0x2   :  { %11 = vst [vmem:[%s45_s1] sm:$0x77] %v10_v0 }
   0x3   :  { %12 = vst [vmem:[%s45_s1 + $0x8] sm:$0x77] %v10_v0 }
   0x4   :  { %13 = vst [vmem:[%s45_s1 + $0x10] sm:$0x77] %v10_v0 }
   0x5   :  { %14 = vst [vmem:[%s45_s1 + $0x18] sm:$0x77] %v10_v0 }

</bundles_post_ra>
